<compile_context>
chip_gen: v7x
topology: tpu7x:2x2x1
jax: 0.10.0
libtpu: 0.0.40
codegen_flags: <defaults>
</compile_context>

<pallas_src>
import math

import jax
import jax.numpy as jnp
from jax.experimental import pallas as pl
from jax.experimental.pallas import tpu as pltpu


def _round_up(x, m):
    return (x + m - 1) // m * m


# -------- Stage 1: support = x @ W  (projection hoisted out of the adj loop) --------
def _support_kernel(x_ref, w_ref, s_ref):
    # x_ref: (1, TM, F_in_pad)   w_ref: (F_in_pad, F_out_pad)   s_ref: (1, TM, F_out_pad)
    s_ref[0] = jnp.dot(
        x_ref[0], w_ref[...], preferred_element_type=jnp.float32
    ).astype(s_ref.dtype)


# -------- Stage 2: out = adj @ support + bias  (tiled, f32 VMEM accumulator) ---------
def _aggregate_kernel(adj_ref, sup_ref, b_ref, o_ref, acc_ref):
    # adj_ref: (1, TM, TK)  sup_ref: (1, TK, F_out_pad)  b_ref: (1, F_out_pad)
    # o_ref:   (1, TM, F_out_pad)  acc_ref: (TM, F_out_pad) f32 scratch
    k = pl.program_id(2)

    @pl.when(k == 0)
    def _():
        acc_ref[...] = jnp.zeros_like(acc_ref)

    acc_ref[...] += jnp.dot(
        adj_ref[0], sup_ref[0], preferred_element_type=jnp.float32
    )

    @pl.when(k == pl.num_programs(2) - 1)
    def _():
        # Bias add + cast once per output tile (epilogue); inner loop is pure MXU accumulate.
        o_ref[0] = (acc_ref[...] + b_ref[...]).astype(o_ref.dtype)


def graph_convolution(
    x,
    adj,
    weight,
    bias=None,
    *,
    compute_dtype=None,            # e.g. jnp.bfloat16 on v6e/v7x; None -> x.dtype
    tile_n=None,                   # adj tile size (TM = TK); auto if None
    vmem_limit_bytes=48 * 1024 * 1024,  # explicit, leaves headroom on v7x's 64 MiB
):
    """Batched GCN layer forward: adj @ (x @ weight) + bias."""
    B, N, F_in = x.shape
    assert weight.shape[0] == F_in
    F_out = weight.shape[1]
    out_dtype = x.dtype
    cdt = compute_dtype if compute_dtype is not None else x.dtype

    # Lane-dense padding: feature dims to multiples of 128; N to a multiple of the tile.
    N_pad = _round_up(max(N, 8), 128)
    if tile_n is None:
        # 256 matches the 2x256^2 MXU on v6e/v7x and is a 128-multiple for v5e.
        tile_n = 256 if N_pad % 256 == 0 else 128
    assert N_pad % tile_n == 0
    F_in_pad = _round_up(F_in, 128)
    F_out_pad = _round_up(F_out, 128)

    if bias is None:
        bias = jnp.zeros((F_out,), dtype=jnp.float32)

    xp = jnp.pad(x, ((0, 0), (0, N_pad - N), (0, F_in_pad - F_in))).astype(cdt)
    adjp = jnp.pad(adj, ((0, 0), (0, N_pad - N), (0, N_pad - N))).astype(cdt)
    wp = jnp.pad(weight, ((0, F_in_pad - F_in), (0, F_out_pad - F_out))).astype(cdt)
    bp = (
        jnp.pad(bias, (0, F_out_pad - F_out))
        .astype(jnp.float32)
        .reshape(1, F_out_pad)
    )

    n_row = N_pad // tile_n

    # Stage 1: support = x @ W  (computed once; avoids redundant MXU work per row tile).
    support = pl.pallas_call(
        _support_kernel,
        out_shape=jax.ShapeDtypeStruct((B, N_pad, F_out_pad), cdt),
        grid_spec=pltpu.PrefetchScalarGridSpec(
            num_scalar_prefetch=0,
            grid=(B, n_row),
            in_specs=[
                pl.BlockSpec((1, tile_n, F_in_pad), lambda b, i: (b, i, 0)),
                pl.BlockSpec((F_in_pad, F_out_pad), lambda b, i: (0, 0)),
            ],
            out_specs=pl.BlockSpec((1, tile_n, F_out_pad), lambda b, i: (b, i, 0)),
        ),
        compiler_params=pltpu.CompilerParams(
            dimension_semantics=("parallel", "parallel"),
            vmem_limit_bytes=vmem_limit_bytes,
        ),
    )(xp, wp)

    # Stage 2: out = adj @ support + bias, tiled with trailing "arbitrary" reduction axis.
    # TODO(synk): for sparse adjacency, switch to num_scalar_prefetch=1 with a per-batch
    # nonzero-block list so the adj index_map skips all-zero (TM, TK) tiles.
    out_p = pl.pallas_call(
        _aggregate_kernel,
        out_shape=jax.ShapeDtypeStruct((B, N_pad, F_out_pad), out_dtype),
        grid_spec=pltpu.PrefetchScalarGridSpec(
            num_scalar_prefetch=0,
            grid=(B, n_row, n_row),
            in_specs=[
                pl.BlockSpec((1, tile_n, tile_n), lambda b, i, k: (b, i, k)),
                pl.BlockSpec((1, tile_n, F_out_pad), lambda b, i, k: (b, k, 0)),
                pl.BlockSpec((1, F_out_pad), lambda b, i, k: (0, 0)),
            ],
            out_specs=pl.BlockSpec((1, tile_n, F_out_pad), lambda b, i, k: (b, i, 0)),
            scratch_shapes=[pltpu.VMEM((tile_n, F_out_pad), jnp.float32)],
        ),
        compiler_params=pltpu.CompilerParams(
            dimension_semantics=("parallel", "parallel", "arbitrary"),
            vmem_limit_bytes=vmem_limit_bytes,
        ),
    )(adjp, support, bp)

    return out_p[:, :N, :F_out]


if __name__ == "__main__":
    # Small shapes consistent with the module's forward semantics.
    B, N = 2, 16          # batch, number of graph nodes
    F_in, F_out = 8, 32   # in_features -> out_features

    key = jax.random.PRNGKey(0)
    k_x, k_adj, k_w, k_b = jax.random.split(key, 4)

    # Deterministic parameter init mirroring reset_parameters():
    # uniform(-stdv, stdv), stdv = 1/sqrt(out_features)
    stdv = 1.0 / math.sqrt(F_out)
    weight = jax.random.uniform(k_w, (F_in, F_out), jnp.float32, -stdv, stdv)
    bias = jax.random.uniform(k_b, (F_out,), jnp.float32, -stdv, stdv)

    x = jax.random.normal(k_x, (B, N, F_in), jnp.float32)
    adj = jax.random.uniform(k_adj, (B, N, N), jnp.float32)

    # f32 path (exact vs reference)
    out = graph_convolution(x, adj, weight, bias)
    out = jax.block_until_ready(out)

    ref = jnp.einsum("bnm,bmf->bnf", adj, jnp.einsum("bni,io->bno", x, weight)) + bias
    assert out.shape == (B, N, F_out)
    assert jnp.allclose(out, ref, atol=1e-5, rtol=1e-5)

    # bf16 compute path (v6e/v7x byte-reduction optimization); f32 accumulation, relaxed tol.
    out_bf16 = graph_convolution(x, adj, weight, bias, compute_dtype=jnp.bfloat16)
    out_bf16 = jax.block_until_ready(out_bf16)
    assert jnp.allclose(out_bf16.astype(jnp.float32), ref, atol=1e-1, rtol=1e-1)

    print("KERNEL_OK")
</pallas_src>

<mosaic_0001>
module attributes {stable_mosaic.version = 11 : i64} {
  func.func @_support_kernel(%arg0: i32, %arg1: i32, %arg2: memref<1x128x128xf32, #tpu.memory_space<vmem>>, %arg3: memref<128x128xf32, #tpu.memory_space<vmem>>, %arg4: memref<1x128x128xf32, #tpu.memory_space<vmem>>) attributes {dimension_semantics = [#tpu.dimension_semantics<parallel>, #tpu.dimension_semantics<parallel>], iteration_bounds = array<i64: 2, 1>, scalar_prefetch = 0 : i64, scratch_operands = 0 : i64, tpu.core_type = #tpu.core_type<tc>, window_params = [{transform_indices = @transform_0, window_bounds = array<i64: 1, 128, 128>}, {pipeline_mode = #tpu.pipeline_mode<synchronous>, transform_indices = @transform_1, window_bounds = array<i64: 128, 128>}, {transform_indices = @transform_2, window_bounds = array<i64: 1, 128, 128>}]} {
    %c0 = arith.constant 0 : index
    %c0_0 = arith.constant 0 : index
    %c0_1 = arith.constant 0 : index
    %0 = vector.load %arg2[%c0, %c0_0, %c0_1] : memref<1x128x128xf32, #tpu.memory_space<vmem>>, vector<1x128x128xf32>
    %1 = vector.shape_cast %0 : vector<1x128x128xf32> to vector<128x128xf32>
    %c0_2 = arith.constant 0 : index
    %c0_3 = arith.constant 0 : index
    %2 = vector.load %arg3[%c0_2, %c0_3] : memref<128x128xf32, #tpu.memory_space<vmem>>, vector<128x128xf32>
    %cst = arith.constant dense<0.000000e+00> : vector<128x128xf32>
    %3 = tpu.matmul %1, %2, %cst {dimension_numbers = #tpu.dot_dimension_numbers<[1], [0], [0], [1], [0, 0, 1, 1], [], []>} : vector<128x128xf32>, vector<128x128xf32>, vector<128x128xf32> -> vector<128x128xf32>
    %c0_4 = arith.constant 0 : index
    %c0_5 = arith.constant 0 : index
    %c0_6 = arith.constant 0 : index
    %4 = vector.load %arg4[%c0_4, %c0_5, %c0_6] : memref<1x128x128xf32, #tpu.memory_space<vmem>>, vector<1x128x128xf32>
    %5 = vector.shape_cast %4 : vector<1x128x128xf32> to vector<128x128xf32>
    %6 = vector.shape_cast %3 : vector<128x128xf32> to vector<1x128x128xf32>
    tpu.vector_store %arg4[%c0_4, %c0_5, %c0_6], %6 {strides = array<i32>} : memref<1x128x128xf32, #tpu.memory_space<vmem>>, vector<1x128x128xf32>,
    return
  }
  func.func @transform_0(%arg0: i32, %arg1: i32) -> (i32, i32, i32) {
    %c0_i32 = arith.constant 0 : i32
    %c0_i32_0 = arith.constant 0 : i32
    return %arg0, %arg1, %c0_i32 : i32, i32, i32
  }
  func.func @transform_1(%arg0: i32, %arg1: i32) -> (i32, i32) {
    %c0_i32 = arith.constant 0 : i32
    %c0_i32_0 = arith.constant 0 : i32
    %c0_i32_1 = arith.constant 0 : i32
    return %c0_i32, %c0_i32_0 : i32, i32
  }
  func.func @transform_2(%arg0: i32, %arg1: i32) -> (i32, i32, i32) {
    %c0_i32 = arith.constant 0 : i32
    %c0_i32_0 = arith.constant 0 : i32
    return %arg0, %arg1, %c0_i32 : i32, i32, i32
  }
}

</mosaic_0001>

<bundles_post_ra>
// kernel: tpu_custom_call.1
= control target key start
LH: loop header
LB: loop body
LE: loop exit
PB: predicated region body
PF: predicated region fallthrough
CT: control target
= control target key end

     0   :  { %7 = vsyncpa [#allocation3], 0  ;;  %s1169_s0 = inlined_call_operand.hbm [shape: f32[2,128,128], index: 0, kind: input, shape index: {}]   ;;  %s1170_s1 = inlined_call_operand.hbm [shape: f32[128,128], index: 1, kind: input, shape index: {}]   ;;  %s1171_s2 = inlined_call_operand.hbm [shape: f32[2,128,128], index: 2, kind: output, shape index: {}]  }
   0x1   :  { %9 = vsyncpa [#allocation3 + $0x1], 0 }
   0x2   :  { %10 = vsyncpa [#allocation6], 0 }
   0x3   :  { %11 = vsyncpa [#allocation4], 0 }
   0x4   :  { %13 = vsyncpa [#allocation4 + $0x1], 0  ;;  %s903_s9 = smov 0   ;;  %s905_s10 = smov 0  }
   0x5   :  { %s907_s11 = smov 0   ;;  %s909_s12 = smov 0  }
   0x6   :  { %s911_s13 = smov 0   ;;  %s913_s14 = smov 0  }
   0x7 LB: > { %s503_s15 = sadd.s32 4294967295, %s879_s14   ;;  %s504_s16 = sadd.s32 4294967294, %s879_s14   ;;  %s879_s14 = sphi %s913_s14, %s19_s14   ;;  %s875_s13 = sphi %s911_s13, %s1195_s13   ;;  %s871_s12 = sphi %s909_s12, %s1194_s12   ;;  %s867_s11 = sphi %s907_s11, %s1193_s11   ;;  %s863_s10 = sphi %s905_s10, %s1192_s10   ;;  %s859_s9 = sphi %s903_s9, %s1191_s9  }
   0x8   : > { %p53_p0 = scmp.ne.s32.totalorder %s863_s10, %s859_s9  ;;  %p937_p1 = scmp.eq.s32.totalorder %s503_s15, 0 }
   0x9   : > { %p941_p2 = scmp.eq.s32.totalorder %s503_s15, 1  ;;  %p106_p3 = scmp.eq.s32.totalorder %s504_s16, 1 }
   0xa   : > { %s1176_s17 = scalar_select %p937_p1, 1, 0 }
   0xb   : > { %s1177_s18 = scalar_select %p941_p2, 1, 0 }
   0xc   : > { %p947_p4 = por %p937_p1, %p53_p0  ;;  %p505_p5 = scmp.ge.s32.totalorder %s879_s14, 1 }
   0xd   : > { %p952_p6 = por %p106_p3, %p53_p0  ;;  %p113_p7 = scmp.lt.s32.totalorder %s879_s14, 3 }
   0xe   : > { %s1178_s19 = scalar_select %p947_p4, 1, 0 }
   0xf   : > { %s1179_s20 = scalar_select %p952_p6, 1, 0 }
  0x10   : > { %p957_p8 = pnand %p505_p5, %p113_p7  ;;  %s881_s22 = smov [#allocation5]  }
  0x11   : > { %s125_s23 = sshll.u32 %s881_s22, 4  ;;  %s31_s25 = sadd.s32 1, %s875_s13  ;;  %s126_s23 = int_to_ptr.vmem [resolvable:$true] %s125_s23 }
  0x12   : > { %s1180_s21 = scalar_select %p957_p8, 1, 0 }
  0x13   : > { %p666_p9 = pneg %p957_p8  ;;  %s735_s28 = scalar_lea.hbm %s1170_s1, 2048 }
  0x14   : > { %p736_p12 = scmp.ne.s32.totalorder %s1170_s1, %s735_s28  ;;  %p742_p5 = scmp.lt.u32.totalorder %s735_s28, %s1170_s1 }
  0x15   : > { %p966_p11 = pnand %p666_p9, %p937_p1 }
  0x17   : > { %p737_p13 = pneg %p966_p11 }
  0x19   : > { %p738_p0 = pnand %p737_p13, %p736_p12 }
  0x1b   : > { %p739_p3 = pneg %p738_p0 }
  0x1d   : > { %p744_p7 = pnand %p742_p5, %p739_p3 }
  0x1f   : > { %747 = shalt.err (!%p744_p7)
}
  0x20   : > { %s748_s5 = scalar_lea.vmem %s126_s23, 2048  ;;  %p756_p1 = scmp.lt.s32.totalorder %s126_s23, %s126_s23 }
  0x21   : > { %p749_p9 = scmp.ne.s32.totalorder %s126_s23, %s748_s5  ;;  %p757_p4 = scmp.lt.s32.totalorder %s748_s5, %s748_s5 }
  0x23   : > { %p751_p10 = pnand %p749_p9, %p737_p13  ;;  %p758_p8 = por %p757_p4, %p756_p1 }
  0x25   : > { %p752_p6 = pneg %p751_p10 }
  0x27   : > { %p759_p2 = pnand %p758_p8, %p752_p6 }
  0x29   : > { %762 = shalt.err (!%p759_p2)
}
  0x2a   : > { %s882_s6 = smov 128   ;;  %s883_s7 = smov 8  }
  0x2b   : > { %669 = dma.hbm_to_vmem [thread:$0]  (!%p966_p11), %s1170_s1, 2048, %s126_s23, [#allocation6], %s882_s6, %s882_s6, %s883_s7  }
  0x2c   : > { %p33_p1 = scmp.ge.s32.totalorder %s31_s25, 2  ;;  %s40_s16 = sadd.s32 1, %s867_s11 }
  0x2d   : > { %p47_p2 = scmp.ne.s32.totalorder %s867_s11, %s863_s10  ;;  %p48_p4 = scmp.eq.s32.totalorder %s879_s14, 0 }
  0x2e   : > { %s1197_s25 = smov (%p33_p1, %s31_s25), 0  ;;  %p1183_p8 = scmp.ne.s32.totalorder %s1177_s18, 0 }
  0x2f   : > { %p996_p6 = por %p48_p4, %p47_p2  ;;  %s35_s26 = ssub.s32 %s875_s13, %s1197_s25 }
  0x30   : > { %p1002_p10 = por %p1183_p8, %p47_p2  ;;  %p679_p12 = scmp.lt.s32.totalorder %s879_s14, 2 }
  0x31   : > { %p38_p11 = scmp.eq.s32.totalorder %s35_s26, 0  ;;  %s139_s23 = sand.u32 1, %s867_s11  }
  0x32   : > { %s508_s27 = sshll.u32 %s139_s23, 7  ;;  %s520_s29 = sshll.u32 %s875_s13, 11 }
  0x33   : > { %s1011_s28 = scalar_select %p38_p11, %s867_s11, %s40_s16  }
  0x34   : > { %s1017_s4 = scalar_lea.hbm %s1169_s0, %s520_s29  ;;  %s143_s18 = scalar_lea.vmem [#allocation2], %s508_s27 }
  0x35   : > { %s152_s5 = sshll.u32 %s143_s18, 4  ;;  %p1023_p13 = pnand %p679_p12, %p996_p6  ;;  %s1019_s5 = int_to_ptr.vmem [resolvable:$true] %s152_s5 }
  0x36   : > { %s1027_s15 = scalar_lea.sflag [#allocation3], %s139_s23  ;;  %s763_s16 = scalar_lea.hbm %s1017_s4, 2048 }
  0x37   : > { %p764_p0 = scmp.ne.s32.totalorder %s1017_s4, %s763_s16  ;;  %p765_p3 = pneg %p1023_p13 }
  0x38   : > { %s768_s22 = scalar_lea.hbm %s1169_s0, 4096  ;;  %p769_p9 = scmp.lt.u32.totalorder %s1017_s4, %s1169_s0 }
  0x39   : > { %p766_p5 = pnand %p765_p3, %p764_p0  ;;  %p770_p1 = scmp.lt.u32.totalorder %s768_s22, %s763_s16 }
  0x3a   : > { %p772_p4 = scmp.lt.u32.totalorder %s763_s16, %s1017_s4 }
  0x3b   : > { %p767_p7 = pneg %p766_p5  ;;  %p771_p2 = por %p770_p1, %p769_p9 }
  0x3d   : > { %p773_p6 = por %p772_p4, %p771_p2 }
  0x3f   : > { %p774_p8 = pnand %p773_p6, %p767_p7 }
  0x41   : > { %777 = shalt.err (!%p774_p8)
}
  0x42   : > { %s778_s23 = scalar_lea.vmem %s1019_s5, 2048  ;;  %s884_s3 = smov [#allocation2]  }
  0x43   : > { %p779_p12 = scmp.ne.s32.totalorder %s1019_s5, %s778_s23  ;;  %s783_s18 = sshll.u32 %s884_s3, 4  ;;  %s784_s18 = int_to_ptr.vmem [resolvable:$false] %s783_s18 }
  0x44   : > { %s785_s26 = scalar_lea.vmem %s784_s18, 4096  ;;  %p786_p5 = scmp.lt.s32.totalorder %s1019_s5, %s784_s18 }
  0x45   : > { %p781_p11 = pnand %p779_p12, %p765_p3  ;;  %p787_p9 = scmp.lt.s32.totalorder %s785_s26, %s778_s23 }
  0x47   : > { %p782_p0 = pneg %p781_p11  ;;  %p788_p1 = por %p787_p9, %p786_p5 }
  0x49   : > { %p789_p2 = pnand %p788_p1, %p782_p0 }
  0x4b   : > { %792 = shalt.err (!%p789_p2)
}
  0x4c   : > { %673 = dma.hbm_to_vmem [thread:$0]  (!%p1023_p13), %s1017_s4, 2048, %s1019_s5, %s1027_s15, %s882_s6, %s882_s6, %s883_s7  }
  0x4d   : > { %p1186_p3 = scmp.ne.s32.totalorder %s1180_s21, 0 }
  0x4e   : > { %s1061_s16 = sand.u32 (!%p1186_p3), 1, %s863_s10   ;;  %p1187_p7 = scmp.ne.s32.totalorder (!%p1186_p3), %s1178_s19, 0 }
  0x4f   : > { %164 = sbr.rel (%p1186_p3) target bundleno = 365 (0x16d), region = 28  ;;  %s512_s27 = sshll.u32 (!%p1186_p3), %s1061_s16, 7 }
  0x50   : > { %s167_s22 = scalar_lea.sflag (!%p1186_p3), [#allocation3], %s1061_s16  ;;  %s1067_s8 = scalar_lea.vmem (!%p1186_p3), [#allocation2], %s512_s27 }
  0x56   : > { %846 = dma.done.wait (%p1187_p7), %s167_s22, 2048  }
  0x57   : > { %848 = vsyncadd (%p1187_p7), %s167_s22, 4294965248  ;;  %p1188_p13 = scmp.ne.s32.totalorder %s1176_s17, 0 }
  0x59   : > { %850 = dma.done.wait (%p1188_p13), [#allocation6], 2048  }
  0x5a   : > { %852 = vsyncadd (%p1188_p13), [#allocation6], 4294965248  ;;  %v213_v0 = vld [vmem:[#allocation5] sm:$0xff]  ;;  %v214_v1 = vld [vmem:[#allocation5 + $0x8] sm:$0xff]  ;;  %s1095_s17 = scalar_lea.vmem [#allocation7], %s512_s27  ;;  %s521_s19 = sshll.u32 %s871_s12, 11 }
  0x5b   : > { %v215_v2 = vld [vmem:[#allocation5 + $0x10] sm:$0xff]  ;;  %v610_v3 = vpack.c.bf16 %v214_v1, %v213_v0  ;;  %v216_v4 = vld [vmem:[#allocation5 + $0x18] sm:$0xff]  ;;  %v217_v6 = vld [vmem:[#allocation5 + $0x20] sm:$0xff]  ;;  %s406_s21 = sshll.u32 %s1095_s17, 4  ;;  %s1114_s4 = scalar_lea.hbm %s1171_s2, %s521_s19  ;;  %s1116_s21 = int_to_ptr.vmem [resolvable:$true] %s406_s21 }
  0x5c   : > { %v614_v5 = vpack.c.bf16 %v216_v4, %v215_v2  ;;  %v218_v7 = vld [vmem:[#allocation5 + $0x28] sm:$0xff]  ;;  %v197_v9 = vld [vmem:[%s1067_s8] sm:$0xff]  ;;  %v219_v11 = vld [vmem:[#allocation5 + $0x30] sm:$0xff]  ;;  %s391_s12 = scalar_lea.sflag [#allocation4], %s1061_s16  ;;  %s793_s5 = scalar_lea.vmem %s1116_s21, 2048 }
  0x5d   : > { %611 = vmatprep.subr.bf16.mxu0 %v610_v3  ;;  %642 = vmatprep.subr.bf16.mxu1 %v610_v3  ;;  %v618_v8 = vpack.c.bf16 %v218_v7, %v217_v6  ;;  %v205_v10 = vld [vmem:[%s1067_s8 + $0x40] sm:$0xff]  ;;  %v220_v12 = vld [vmem:[#allocation5 + $0x38] sm:$0xff]  ;;  %v222_v15 = vld [vmem:[#allocation5 + $0x48] sm:$0xff]  ;;  %p794_p4 = scmp.ne.s32.totalorder %s1116_s21, %s793_s5  ;;  %s885_s15 = smov [#allocation7]  }
  0x5e   : > { %613 = vmatpush3.bf16.msra.mxu0 %v610_v3  ;;  %650 = vmatpush3.bf16.msra.mxu1 %v610_v3  ;;  %v622_v13 = vpack.c.bf16 %v220_v12, %v219_v11  ;;  %v221_v14 = vld [vmem:[#allocation5 + $0x40] sm:$0xff]  ;;  %v223_v17 = vld [vmem:[#allocation5 + $0x50] sm:$0xff]  ;;  %v224_v18 = vld [vmem:[#allocation5 + $0x58] sm:$0xff]  ;;  %s797_s29 = sshll.u32 %s885_s15, 4  ;;  %s798_s29 = int_to_ptr.vmem [resolvable:$false] %s797_s29 }
  0x5f   : > { %615 = vmatprep.subr.bf16.mxu0 %v614_v5  ;;  %643 = vmatprep.subr.bf16.mxu1 %v614_v5  ;;  %v626_v16 = vpack.c.bf16 %v222_v15, %v221_v14  ;;  %v630_v19 = vpack.c.bf16 %v224_v18, %v223_v17  ;;  %v225_v20 = vld [vmem:[#allocation5 + $0x60] sm:$0xff]  ;;  %v226_v21 = vld [vmem:[#allocation5 + $0x68] sm:$0xff]  ;;  %v227_v23 = vld [vmem:[#allocation5 + $0x70] sm:$0xff]  ;;  %p795_p6 = pnand %p794_p4, %p1002_p10  ;;  %s799_s30 = scalar_lea.vmem %s798_s29, 4096 }
  0x60   : > { %586 = vmatprep.mubr.f32.mxu0 %v197_v9  ;;  %598 = vmatprep.mubr.f32.mxu1 %v205_v10  ;;  %v634_v22 = vpack.c.bf16 %v226_v21, %v225_v20  ;;  %v228_v24 = vld [vmem:[#allocation5 + $0x78] sm:$0xff]  ;;  %v198_v26 = vld [vmem:[%s1067_s8 + $0x8] sm:$0xff]  ;;  %v199_v28 = vld [vmem:[%s1067_s8 + $0x10] sm:$0xff]  ;;  %p800_p12 = scmp.lt.s32.totalorder %s1116_s21, %s798_s29  ;;  %p801_p11 = scmp.lt.s32.totalorder %s799_s30, %s793_s5 }
  0x61   : > { %v638_v25 = vpack.c.bf16 %v228_v24, %v227_v23  ;;  %v206_v27 = vld [vmem:[%s1067_s8 + $0x48] sm:$0xff]  ;;  %v207_v29 = vld [vmem:[%s1067_s8 + $0x50] sm:$0xff]  ;;  %v200_v30 = vld [vmem:[%s1067_s8 + $0x18] sm:$0xff]  ;;  %p796_p8 = pneg %p795_p6 }
  0x62   : > { %617 = vmatpush3.bf16.msra.mxu0 %v614_v5  ;;  %651 = vmatpush3.bf16.msra.mxu1 %v614_v5  ;;  %v208_v31 = vld [vmem:[%s1067_s8 + $0x58] sm:$0xff]  ;;  %v201_v32 = vld [vmem:[%s1067_s8 + $0x20] sm:$0xff]  ;;  %v202_v34 = vld [vmem:[%s1067_s8 + $0x28] sm:$0xff]  ;;  %p802_p0 = por %p801_p11, %p800_p12 }
  0x63   : > { %619 = vmatprep.subr.bf16.mxu0 %v618_v8  ;;  %644 = vmatprep.subr.bf16.mxu1 %v618_v8  ;;  %v209_v33 = vld [vmem:[%s1067_s8 + $0x60] sm:$0xff]  ;;  %v210_v35 = vld [vmem:[%s1067_s8 + $0x68] sm:$0xff]  ;;  %v203_v36 = vld [vmem:[%s1067_s8 + $0x30] sm:$0xff] }
  0x64   : > { %v211_v37 = vld [vmem:[%s1067_s8 + $0x70] sm:$0xff]  ;;  %v204_v38 = vld [vmem:[%s1067_s8 + $0x38] sm:$0xff]  ;;  %p803_p5 = pnand %p802_p0, %p796_p8 }
  0x65   : > { %v212_v39 = vld [vmem:[%s1067_s8 + $0x78] sm:$0xff] }
  0x66   : > { %621 = vmatpush3.bf16.msra.mxu0 %v618_v8  ;;  %652 = vmatpush3.bf16.msra.mxu1 %v618_v8 }
  0x67   : > { %623 = vmatprep.subr.bf16.mxu0 %v622_v13  ;;  %645 = vmatprep.subr.bf16.mxu1 %v622_v13 }
  0x6a   : > { %625 = vmatpush3.bf16.msra.mxu0 %v622_v13  ;;  %653 = vmatpush3.bf16.msra.mxu1 %v622_v13 }
  0x6b   : > { %627 = vmatprep.subr.bf16.mxu0 %v626_v16  ;;  %646 = vmatprep.subr.bf16.mxu1 %v626_v16 }
  0x6e   : > { %629 = vmatpush3.bf16.msra.mxu0 %v626_v16  ;;  %654 = vmatpush3.bf16.msra.mxu1 %v626_v16 }
  0x6f   : > { %631 = vmatprep.subr.bf16.mxu0 %v630_v19  ;;  %647 = vmatprep.subr.bf16.mxu1 %v630_v19 }
  0x72   : > { %633 = vmatpush3.bf16.msra.mxu0 %v630_v19  ;;  %655 = vmatpush3.bf16.msra.mxu1 %v630_v19 }
  0x73   : > { %635 = vmatprep.subr.bf16.mxu0 %v634_v22  ;;  %648 = vmatprep.subr.bf16.mxu1 %v634_v22 }
  0x76   : > { %637 = vmatpush3.bf16.msra.mxu0 %v634_v22  ;;  %656 = vmatpush3.bf16.msra.mxu1 %v634_v22 }
  0x77   : > { %639 = vmatprep.subr.bf16.mxu0 %v638_v25  ;;  %649 = vmatprep.subr.bf16.mxu1 %v638_v25 }
  0x7a   : > { %641 = vmatpush3.bf16.msra.mxu0 %v638_v25  ;;  %657 = vmatpush3.bf16.msra.mxu1 %v638_v25 }
  0x7d   : > { %587 = vmatmul.mubr.f32.vlgmr.msra.gmra.mrb[0].mxu0 %v198_v26  ;;  %599 = vmatmul.mubr.f32.vlgmr.msra.gmra.mrb[0].mxu1 %v206_v27 }
  0x7e   : > { %589 = vmatprep.mubr.f32.mxu0 %v199_v28  ;;  %601 = vmatprep.mubr.f32.mxu1 %v207_v29 }
  0x81   : > { %590 = vmatmul.mubr.f32.gmra.mrb[2].mxu0 %v200_v30  ;;  %602 = vmatmul.mubr.f32.gmra.mrb[2].mxu1 %v208_v31 }
  0x82   : > { %592 = vmatprep.mubr.f32.mxu0 %v201_v32  ;;  %604 = vmatprep.mubr.f32.mxu1 %v209_v33 }
  0x85   : > { %593 = vmatmul.mubr.f32.gmra.mrb[4].mxu0 %v202_v34  ;;  %605 = vmatmul.mubr.f32.gmra.mrb[4].mxu1 %v210_v35 }
  0x86   : > { %595 = vmatprep.mubr.f32.mxu0 %v203_v36  ;;  %607 = vmatprep.mubr.f32.mxu1 %v211_v37 }
  0x89   : > { %596 = vmatmul.mubr.f32.gmra.mrb[6].mxu0 %v204_v38  ;;  %608 = vmatmul.mubr.f32.gmra.mrb[6].mxu1 %v212_v39 }
 0x150   : > { %v588_v40 = vpop.f32.mrb[0].mxu0  ;;  %v600_v41 = vpop.f32.mrb[0].mxu1 }
 0x151   : > { %375 = vst [vmem:[%s1095_s17 + $0x8] sm:$0xff] %v588_v40  ;;  %383 = vst [vmem:[%s1095_s17 + $0x48] sm:$0xff] %v600_v41  ;;  %v295_v42 = vpop.f32.mrb[1].mxu0  ;;  %v335_v43 = vpop.f32.mrb[1].mxu1 }
 0x152   : > { %374 = vst [vmem:[%s1095_s17] sm:$0xff] %v295_v42  ;;  %382 = vst [vmem:[%s1095_s17 + $0x40] sm:$0xff] %v335_v43 }
 0x154   : > { %v591_v44 = vpop.f32.mrb[2].mxu0  ;;  %v603_v45 = vpop.f32.mrb[2].mxu1 }
 0x155   : > { %377 = vst [vmem:[%s1095_s17 + $0x18] sm:$0xff] %v591_v44  ;;  %385 = vst [vmem:[%s1095_s17 + $0x58] sm:$0xff] %v603_v45  ;;  %v305_v46 = vpop.f32.mrb[3].mxu0  ;;  %v345_v47 = vpop.f32.mrb[3].mxu1 }
 0x156   : > { %376 = vst [vmem:[%s1095_s17 + $0x10] sm:$0xff] %v305_v46  ;;  %384 = vst [vmem:[%s1095_s17 + $0x50] sm:$0xff] %v345_v47 }
 0x158   : > { %v594_v48 = vpop.f32.mrb[4].mxu0  ;;  %v606_v49 = vpop.f32.mrb[4].mxu1 }
 0x159   : > { %379 = vst [vmem:[%s1095_s17 + $0x28] sm:$0xff] %v594_v48  ;;  %387 = vst [vmem:[%s1095_s17 + $0x68] sm:$0xff] %v606_v49  ;;  %v315_v50 = vpop.f32.mrb[5].mxu0  ;;  %v355_v51 = vpop.f32.mrb[5].mxu1 }
 0x15a   : > { %378 = vst [vmem:[%s1095_s17 + $0x20] sm:$0xff] %v315_v50  ;;  %386 = vst [vmem:[%s1095_s17 + $0x60] sm:$0xff] %v355_v51 }
 0x15c   : > { %v597_v52 = vpop.f32.mrb[6].mxu0  ;;  %v609_v53 = vpop.f32.mrb[6].mxu1 }
 0x15d   : > { %381 = vst [vmem:[%s1095_s17 + $0x38] sm:$0xff] %v597_v52  ;;  %389 = vst [vmem:[%s1095_s17 + $0x78] sm:$0xff] %v609_v53  ;;  %v325_v54 = vpop.f32.mrb[7].mxu0  ;;  %v365_v55 = vpop.f32.mrb[7].mxu1 }
 0x15e   : > { %380 = vst [vmem:[%s1095_s17 + $0x30] sm:$0xff] %v325_v54  ;;  %388 = vst [vmem:[%s1095_s17 + $0x70] sm:$0xff] %v365_v55 }
 0x15f   : > { %806 = shalt.err (!%p803_p5)
}
 0x160   : > { %s807_s23 = scalar_lea.hbm %s1114_s4, 2048  ;;  %s811_s26 = scalar_lea.hbm %s1171_s2, 4096 }
 0x161   : > { %p808_p9 = scmp.ne.s32.totalorder %s1114_s4, %s807_s23  ;;  %p812_p3 = scmp.lt.u32.totalorder %s1114_s4, %s1171_s2 }
 0x162   : > { %p813_p7 = scmp.lt.u32.totalorder %s811_s26, %s807_s23  ;;  %p815_p4 = scmp.lt.u32.totalorder %s807_s23, %s1114_s4 }
 0x163   : > { %p809_p1 = pnand %p808_p9, %p1002_p10 }
 0x164   : > { %p814_p13 = por %p813_p7, %p812_p3 }
 0x165   : > { %p810_p2 = pneg %p809_p1 }
 0x166   : > { %p816_p6 = por %p815_p4, %p814_p13 }
 0x168   : > { %p817_p8 = pnand %p816_p6, %p810_p2 }
 0x16a   : > { %820 = shalt.err (!%p817_p8)
}
 0x16b   : > { %s886_s8 = smov 128   ;;  %s887_s17 = smov 8  }
 0x16c   : > { %664 = dma.vmem_to_hbm [thread:$0]  (%p1002_p10), %s1116_s21, 2048, %s1114_s4, %s391_s12, %s886_s8, %s886_s8, %s887_s17  }
 0x16d PF: > { %s421_s19 = sand.u32 1, %s859_s9   ;;  %p1189_p12 = scmp.ne.s32.totalorder %s1179_s20, 0 }
 0x16e   : > { %p1190_p11 = scmp.ge.s32.totalorder %s879_s14, 2  ;;  %s422_s6 = scalar_lea.sflag [#allocation4], %s421_s19 }
 0x170   : > { %p675_p0 = pnand %p1190_p11, %p1189_p12 }
 0x172   : > { %854 = dma.done.wait (!%p675_p0), %s422_s6, 2048  }
 0x173   : > { %856 = vsyncadd (!%p675_p0), %s422_s6, 4294965248  ;;  %s19_s14 = sadd.s32 1, %s879_s14   ;;  %s1191_s9 = smov %s863_s10 }
 0x174   : > { %p16_p5 = scmp.ge.s32.totalorder %s19_s14, 4   ;;  %s1192_s10 = smov %s867_s11 }
 0x175   : > { %s1193_s11 = smov %s1011_s28  ;;  %s1194_s12 = smov %s875_s13 }
 0x176   : > { %s1195_s13 = smov %s1197_s25  ;;  %18 = sbr.rel (!%p16_p5) target bundleno = 7 (0x7), region = 77 }
 0x17d   :  { %427 = vsyncpa [#allocation3], 1 }
 0x17e   :  { %429 = vsyncpa [#allocation3 + $0x1], 1 }
 0x17f   :  { %430 = vsyncpa [#allocation6], 1 }
 0x180   :  { %431 = vsyncpa [#allocation4], 1 }
 0x181   :  { %433 = vsyncpa [#allocation4 + $0x1], 1 }

</bundles_post_ra>
